<compile_context>
chip_gen: v7x
topology: tpu7x:2x2x1
jax: 0.10.0
libtpu: 0.0.40
codegen_flags: <defaults>
</compile_context>

<pallas_src>
import functools

import jax
import jax.numpy as jnp
from jax.experimental import pallas as pl
from jax.experimental.pallas import tpu as pltpu


def _round_up(x, m):
    return ((x + m - 1) // m) * m


def mlp_kernel(xt_ref, w1_ref, b1_ref, w2_ref, b2_ref, w3_ref, b3_ref, o_ref):
    """One batch tile; batch is on the lane (last) axis throughout.

    xt_ref : (20, TM)  input tile, transposed
    w1_ref : (64, 20)  PyTorch layout (out_features, in_features)
    b1_ref : (64, 1)
    w2_ref : (64, 64)
    b2_ref : (64, 1)
    w3_ref : (64, 1)   third-layer weight as a column
    b3_ref : (1,)      scalar bias in SMEM
    o_ref  : (1, TM)   lane-dense sigmoid output for this tile
    """
    xt = xt_ref[...]                                                     # (20, TM)

    # Layer 1: Linear(20 -> 64) + ReLU                      (MXU, f32 accumulation)
    h1 = jnp.dot(w1_ref[...], xt, preferred_element_type=jnp.float32)   # (64, TM)
    h1 = jnp.maximum(h1 + b1_ref[...], 0.0)

    # Layer 2: Linear(64 -> 64) + ReLU
    h2 = jnp.dot(w2_ref[...], h1, preferred_element_type=jnp.float32)   # (64, TM)
    h2 = jnp.maximum(h2 + b2_ref[...], 0.0)

    # Layer 3: Linear(64 -> 1) + Sigmoid.  N=1 matmul replaced by VPU multiply +
    # sublane reduce; the result is already lane-major, so the store is unmasked.
    logits = jnp.sum(h2 * w3_ref[...], axis=0, keepdims=True) + b3_ref[0]  # (1, TM)
    o_ref[...] = jax.nn.sigmoid(logits).astype(o_ref.dtype)


@functools.partial(jax.jit, static_argnames=("block_batch",))
def model2_forward(x, w1, b1, w2, b2, w3, b3, *, block_batch=512):
    """x: (B, 20); params in PyTorch nn.Linear layout (weight=(out,in), bias=(out,))."""
    B, F = x.shape

    # Lane-dense batch tile (multiple of 128); pad batch to a whole number of tiles.
    tm = min(block_batch, _round_up(B, 128))
    padded_b = _round_up(B, tm)
    num_tiles = padded_b // tm

    # Layout plumbing (outside the kernel): batch -> lane axis, biases -> columns.
    xt = jnp.pad(x, ((0, padded_b - B), (0, 0))).T        # (20, padded_B)
    b1c = b1.reshape(-1, 1)                               # (64, 1)
    b2c = b2.reshape(-1, 1)                               # (64, 1)
    w3c = w3.reshape(-1, 1)                               # (64, 1)
    b3s = b3.reshape(-1)                                  # (1,) scalar -> SMEM

    # Weights/biases: full-array blocks with a constant index_map -> fetched once,
    # resident in VMEM across all grid steps.
    resident = lambda a: pl.BlockSpec(a.shape, lambda i, _nd=a.ndim: (0,) * _nd)

    flops = 2 * padded_b * (20 * 64 + 64 * 64 + 64)
    bytes_accessed = 4 * (F * padded_b + padded_b
                          + 64 * 20 + 64 * 64 + 3 * 64 + 1)

    out2d = pl.pallas_call(
        mlp_kernel,
        out_shape=jax.ShapeDtypeStruct((1, padded_b), jnp.float32),
        grid=(num_tiles,),
        in_specs=[
            pl.BlockSpec((F, tm), lambda i: (0, i)),            # x tile (pipelined)
            resident(w1), resident(b1c),
            resident(w2), resident(b2c),
            resident(w3c),
            pl.BlockSpec(memory_space=pltpu.MemorySpace.SMEM),  # b3 scalar
        ],
        out_specs=pl.BlockSpec((1, tm), lambda i: (0, i)),      # lane-dense output
        compiler_params=pltpu.CompilerParams(
            dimension_semantics=("parallel",)),                 # v7x: 2 TCs share batch
        cost_estimate=pl.CostEstimate(
            flops=flops, transcendentals=padded_b, bytes_accessed=bytes_accessed),
    )(xt, w1, b1c, w2, b2c, w3c, b3s)

    return out2d[0, :B].reshape(B, 1)


def init_params(key):
    """Deterministic init mimicking PyTorch nn.Linear defaults, in PyTorch layout."""
    ks = jax.random.split(key, 6)

    def linear(kw, kb, fan_in, fan_out):
        bound = 1.0 / jnp.sqrt(fan_in)
        w = jax.random.uniform(kw, (fan_out, fan_in), jnp.float32, -bound, bound)
        b = jax.random.uniform(kb, (fan_out,), jnp.float32, -bound, bound)
        return w, b

    w1, b1 = linear(ks[0], ks[1], 20, 64)
    w2, b2 = linear(ks[2], ks[3], 64, 64)
    w3, b3 = linear(ks[4], ks[5], 64, 1)
    return w1, b1, w2, b2, w3, b3


def reference_forward(x, w1, b1, w2, b2, w3, b3):
    h1 = jax.nn.relu(x @ w1.T + b1)
    h2 = jax.nn.relu(h1 @ w2.T + b2)
    return jax.nn.sigmoid(h2 @ w3.T + b3)


if __name__ == "__main__":
    key = jax.random.PRNGKey(0)
    k_params, k_x = jax.random.split(key)

    params = init_params(k_params)

    # Small case (batch=8, in_features=20) — single grid step after padding to 128.
    x = jax.random.normal(k_x, (8, 20), jnp.float32)
    out = jax.block_until_ready(model2_forward(x, *params))
    ref = reference_forward(x, *params)
    assert out.shape == (8, 1), out.shape
    assert jnp.allclose(out, ref, atol=1e-5, rtol=1e-5), "mismatch vs reference"

    # Larger ragged batch — exercises the multi-tile grid + padding path.
    x_big = jax.random.normal(k_x, (1000, 20), jnp.float32)
    out_big = jax.block_until_ready(model2_forward(x_big, *params))
    ref_big = reference_forward(x_big, *params)
    assert out_big.shape == (1000, 1), out_big.shape
    assert jnp.allclose(out_big, ref_big, atol=1e-5, rtol=1e-5), "mismatch vs reference (big)"

    print("KERNEL_OK")
</pallas_src>

<mosaic_0001>
module attributes {stable_mosaic.version = 11 : i64} {
  func.func @mlp_kernel(%arg0: i32, %arg1: memref<20x128xf32, #tpu.memory_space<vmem>>, %arg2: memref<64x20xf32, #tpu.memory_space<vmem>>, %arg3: memref<64x1xf32, #tpu.memory_space<vmem>>, %arg4: memref<64x64xf32, #tpu.memory_space<vmem>>, %arg5: memref<64x1xf32, #tpu.memory_space<vmem>>, %arg6: memref<64x1xf32, #tpu.memory_space<vmem>>, %arg7: memref<1xf32, #tpu.memory_space<smem>>, %arg8: memref<1x128xf32, #tpu.memory_space<vmem>>) attributes {dimension_semantics = [#tpu.dimension_semantics<parallel>], iteration_bounds = array<i64: 1>, scalar_prefetch = 0 : i64, scratch_operands = 0 : i64, tpu.core_type = #tpu.core_type<tc>, window_params = [{transform_indices = @transform_0, window_bounds = array<i64: 20, 128>}, {pipeline_mode = #tpu.pipeline_mode<synchronous>, transform_indices = @transform_1, window_bounds = array<i64: 64, 20>}, {pipeline_mode = #tpu.pipeline_mode<synchronous>, transform_indices = @transform_2, window_bounds = array<i64: 64, 1>}, {pipeline_mode = #tpu.pipeline_mode<synchronous>, transform_indices = @transform_3, window_bounds = array<i64: 64, 64>}, {pipeline_mode = #tpu.pipeline_mode<synchronous>, transform_indices = @transform_4, window_bounds = array<i64: 64, 1>}, {pipeline_mode = #tpu.pipeline_mode<synchronous>, transform_indices = @transform_5, window_bounds = array<i64: 64, 1>}, {transform_indices = @transform_6, window_bounds = array<i64: 1>}, {transform_indices = @transform_7, window_bounds = array<i64: 1, 128>}]} {
    %c0 = arith.constant 0 : index
    %c0_0 = arith.constant 0 : index
    %0 = vector.load %arg1[%c0, %c0_0] : memref<20x128xf32, #tpu.memory_space<vmem>>, vector<20x128xf32>
    %c0_1 = arith.constant 0 : index
    %c0_2 = arith.constant 0 : index
    %1 = vector.load %arg2[%c0_1, %c0_2] : memref<64x20xf32, #tpu.memory_space<vmem>>, vector<64x20xf32>
    %cst = arith.constant dense<0.000000e+00> : vector<64x128xf32>
    %2 = tpu.matmul %1, %0, %cst {dimension_numbers = #tpu.dot_dimension_numbers<[1], [0], [0], [1], [0, 0, 1, 1], [], []>} : vector<64x20xf32>, vector<20x128xf32>, vector<64x128xf32> -> vector<64x128xf32>
    %c0_3 = arith.constant 0 : index
    %c0_4 = arith.constant 0 : index
    %3 = vector.load %arg3[%c0_3, %c0_4] : memref<64x1xf32, #tpu.memory_space<vmem>>, vector<64x1xf32>
    %4 = vector.broadcast %3 : vector<64x1xf32> to vector<64x128xf32>
    %5 = arith.addf %2, %4 : vector<64x128xf32>
    %cst_5 = arith.constant 0.000000e+00 : f32
    %6 = vector.broadcast %cst_5 : f32 to vector<64x128xf32>
    %7 = arith.maximumf %5, %6 : vector<64x128xf32>
    %c0_6 = arith.constant 0 : index
    %c0_7 = arith.constant 0 : index
    %8 = vector.load %arg4[%c0_6, %c0_7] : memref<64x64xf32, #tpu.memory_space<vmem>>, vector<64x64xf32>
    %cst_8 = arith.constant dense<0.000000e+00> : vector<64x128xf32>
    %9 = tpu.matmul %8, %7, %cst_8 {dimension_numbers = #tpu.dot_dimension_numbers<[1], [0], [0], [1], [0, 0, 1, 1], [], []>} : vector<64x64xf32>, vector<64x128xf32>, vector<64x128xf32> -> vector<64x128xf32>
    %c0_9 = arith.constant 0 : index
    %c0_10 = arith.constant 0 : index
    %10 = vector.load %arg5[%c0_9, %c0_10] : memref<64x1xf32, #tpu.memory_space<vmem>>, vector<64x1xf32>
    %11 = vector.broadcast %10 : vector<64x1xf32> to vector<64x128xf32>
    %12 = arith.addf %9, %11 : vector<64x128xf32>
    %cst_11 = arith.constant 0.000000e+00 : f32
    %13 = vector.broadcast %cst_11 : f32 to vector<64x128xf32>
    %14 = arith.maximumf %12, %13 : vector<64x128xf32>
    %c0_12 = arith.constant 0 : index
    %c0_13 = arith.constant 0 : index
    %15 = vector.load %arg6[%c0_12, %c0_13] : memref<64x1xf32, #tpu.memory_space<vmem>>, vector<64x1xf32>
    %16 = vector.broadcast %15 : vector<64x1xf32> to vector<64x128xf32>
    %17 = arith.mulf %14, %16 : vector<64x128xf32>
    %cst_14 = arith.constant dense<0.000000e+00> : vector<128xf32>
    %18 = vector.multi_reduction <add>, %17, %cst_14 [0] : vector<64x128xf32> to vector<128xf32>
    %19 = vector.shape_cast %18 : vector<128xf32> to vector<1x128xf32>
    %c0_15 = arith.constant 0 : index
    %20 = memref.load %arg7[%c0_15] : memref<1xf32, #tpu.memory_space<smem>>
    %21 = vector.broadcast %20 : f32 to vector<1x128xf32>
    %22 = arith.addf %19, %21 : vector<1x128xf32>
    %23 = arith.negf %22 : vector<1x128xf32>
    %24 = math.exp %23 : vector<1x128xf32>
    %cst_16 = arith.constant 1.000000e+00 : f32
    %25 = vector.broadcast %cst_16 : f32 to vector<1x128xf32>
    %26 = arith.addf %25, %24 : vector<1x128xf32>
    %27 = arith.divf %25, %26 : vector<1x128xf32>
    %c0_17 = arith.constant 0 : index
    %c0_18 = arith.constant 0 : index
    %28 = vector.load %arg8[%c0_17, %c0_18] : memref<1x128xf32, #tpu.memory_space<vmem>>, vector<1x128xf32>
    tpu.vector_store %arg8[%c0_17, %c0_18], %27 {strides = array<i32>} : memref<1x128xf32, #tpu.memory_space<vmem>>, vector<1x128xf32>,
    return
  }
  func.func @transform_0(%arg0: i32) -> (i32, i32) {
    %c0_i32 = arith.constant 0 : i32
    %c0_i32_0 = arith.constant 0 : i32
    return %c0_i32, %arg0 : i32, i32
  }
  func.func @transform_1(%arg0: i32) -> (i32, i32) {
    %c0_i32 = arith.constant 0 : i32
    %c0_i32_0 = arith.constant 0 : i32
    %c0_i32_1 = arith.constant 0 : i32
    return %c0_i32, %c0_i32_0 : i32, i32
  }
  func.func @transform_2(%arg0: i32) -> (i32, i32) {
    %c0_i32 = arith.constant 0 : i32
    %c0_i32_0 = arith.constant 0 : i32
    %c0_i32_1 = arith.constant 0 : i32
    return %c0_i32, %c0_i32_0 : i32, i32
  }
  func.func @transform_3(%arg0: i32) -> (i32, i32) {
    %c0_i32 = arith.constant 0 : i32
    %c0_i32_0 = arith.constant 0 : i32
    %c0_i32_1 = arith.constant 0 : i32
    return %c0_i32, %c0_i32_0 : i32, i32
  }
  func.func @transform_4(%arg0: i32) -> (i32, i32) {
    %c0_i32 = arith.constant 0 : i32
    %c0_i32_0 = arith.constant 0 : i32
    %c0_i32_1 = arith.constant 0 : i32
    return %c0_i32, %c0_i32_0 : i32, i32
  }
  func.func @transform_5(%arg0: i32) -> (i32, i32) {
    %c0_i32 = arith.constant 0 : i32
    %c0_i32_0 = arith.constant 0 : i32
    %c0_i32_1 = arith.constant 0 : i32
    return %c0_i32, %c0_i32_0 : i32, i32
  }
  func.func @transform_6(%arg0: i32) -> i32 {
    %c0_i32 = arith.constant 0 : i32
    %c0_i32_0 = arith.constant 0 : i32
    return %c0_i32 : i32
  }
  func.func @transform_7(%arg0: i32) -> (i32, i32) {
    %c0_i32 = arith.constant 0 : i32
    %c0_i32_0 = arith.constant 0 : i32
    return %c0_i32, %arg0 : i32, i32
  }
}

</mosaic_0001>

<bundles_post_ra>
// kernel: model2_forward.1
= control target key start
LH: loop header
LB: loop body
LE: loop exit
PB: predicated region body
PF: predicated region fallthrough
CT: control target
= control target key end

     0   :  { %vm86_vm0 = vcmask 162816   ;;  %v631_v2 = vmov 0   ;;  %vm111_vm1 = vcmask 1043456   ;;  %vm284_vm2 = vcmask 523264   ;;  %s823_s0 = inlined_call_operand.vmem [shape: f32[20,128], index: 0, kind: input, shape index: {}]   ;;  %s824_s1 = inlined_call_operand.vmem [shape: f32[64,20], index: 1, kind: input, shape index: {}]   ;;  %s825_s2 = inlined_call_operand.vmem [shape: f32[64,1], index: 2, kind: input, shape index: {}]   ;;  %s826_s4 = inlined_call_operand.vmem [shape: f32[64,1], index: 4, kind: input, shape index: {}]   ;;  %s827_s5 = inlined_call_operand.vmem [shape: f32[64,1], index: 5, kind: input, shape index: {}]   ;;  %s828_s3 = inlined_call_operand.vmem [shape: f32[64,64], index: 3, kind: input, shape index: {}]   ;;  %s829_s6 = inlined_call_operand.<no memory space> [shape: f32[1], index: 6, kind: input, shape index: {}]   ;;  %s830_s7 = inlined_call_operand.vmem [shape: f32[1,128], index: 7, kind: output, shape index: {}]  }
   0x1   :  { %v27_v0 = vld [vmem:[%s823_s0] sm:$0xff]  ;;  %v28_v1 = vld [vmem:[%s823_s0 + $0x8] sm:$0xff]  ;;  %625 = vset.pattern.permute.xlu0 %v631_v2  ;;  %626 = vset.pattern.permute.xlu1 %v631_v2  ;;  %v29_v5 = vld [vmem:[%s823_s0 + $0x10] sm:$0xf] }
   0x2   :  { %v596_v3 = vpack.c.bf16 %v28_v1, %v27_v0  ;;  %v30_v4 = vld [vmem:[%s824_s1] sm:$0xff]  ;;  %v40_v7 = vld [vmem:[%s825_s2 + $0x10] sm:$0xff]  ;;  %v39_v8 = vld [vmem:[%s825_s2 + $0x8] sm:$0xff] }
   0x3   :  { %556 = vmatprep.mubr.msk.f32.mxu0 %vm86_vm0, %v30_v4  ;;  %v38_v6 = vld [vmem:[%s825_s2] sm:$0xff]  ;;  %58 = vperm.xlu1 %626, %v40_v7   ;;  %v31_v9 = vld [vmem:[%s824_s1 + $0x8] sm:$0xff]  ;;  %v41_v10 = vld [vmem:[%s825_s2 + $0x18] sm:$0xff] }
   0x4   :  { %597 = vmatprep.subr.bf16.mxu0 %v596_v3  ;;  %48 = vperm.xlu0 %625, %v38_v6   ;;  %v32_v11 = vld [vmem:[%s824_s1 + $0x10] sm:$0xff]  ;;  %v42_v12 = vld [vmem:[%s825_s2 + $0x20] sm:$0xff]  ;;  %v33_v13 = vld [vmem:[%s824_s1 + $0x18] sm:$0xff] }
   0x5   :  { %599 = vmatpush3.bf16.msra.mxu0 %v596_v3  ;;  %v43_v14 = vld [vmem:[%s825_s2 + $0x28] sm:$0xff]  ;;  %v34_v15 = vld [vmem:[%s824_s1 + $0x20] sm:$0xff]  ;;  %v44_v16 = vld [vmem:[%s825_s2 + $0x30] sm:$0xff] }
   0x6   :  { %554 = vmatprep.subr.msk.mxu0 %vm111_vm1, %v29_v5  ;;  %v35_v17 = vld [vmem:[%s824_s1 + $0x28] sm:$0xff]  ;;  %v45_v18 = vld [vmem:[%s825_s2 + $0x38] sm:$0xff]  ;;  %v36_v19 = vld [vmem:[%s824_s1 + $0x30] sm:$0xff] }
   0x7   :  { %63 = vperm.xlu1 %626, %v41_v10   ;;  %v236_v20 = vld [vmem:[%s826_s4] sm:$0xff]  ;;  %v37_v21 = vld [vmem:[%s824_s1 + $0x38] sm:$0xff]  ;;  %v237_v22 = vld [vmem:[%s826_s4 + $0x8] sm:$0xff] }
   0x8   :  { %53 = vperm.xlu0 %625, %v39_v8   ;;  %v238_v23 = vld [vmem:[%s826_s4 + $0x10] sm:$0xff]  ;;  %v239_v24 = vld [vmem:[%s826_s4 + $0x18] sm:$0xff]  ;;  %v422_v25 = vld [vmem:[%s827_s5] sm:$0xff] }
   0x9   :  { %555 = vmatpush3.msk.msra.mxu0 %vm111_vm1, %v29_v5  ;;  %v423_v26 = vld [vmem:[%s827_s5 + $0x8] sm:$0xff]  ;;  %v240_v27 = vld [vmem:[%s826_s4 + $0x20] sm:$0xff]  ;;  %v424_v28 = vld [vmem:[%s827_s5 + $0x10] sm:$0xff] }
   0xa   :  { %557 = vmatmul.mubr.msk.f32.vlgmr.msra.gmra.mrb[0].mxu0 %vm86_vm0, %v31_v9  ;;  %v241_v29 = vld [vmem:[%s826_s4 + $0x28] sm:$0xff]  ;;  %v425_v30 = vld [vmem:[%s827_s5 + $0x18] sm:$0xff]  ;;  %v242_v31 = vld [vmem:[%s826_s4 + $0x30] sm:$0xff] }
   0xb   :  { %559 = vmatprep.mubr.msk.f32.mxu0 %vm86_vm0, %v32_v11  ;;  %73 = vperm.xlu1 %626, %v43_v14   ;;  %v426_v32 = vld [vmem:[%s827_s5 + $0x20] sm:$0xff]  ;;  %v243_v33 = vld [vmem:[%s826_s4 + $0x38] sm:$0xff]  ;;  %v427_v34 = vld [vmem:[%s827_s5 + $0x28] sm:$0xff] }
   0xc   :  { %68 = vperm.xlu0 %625, %v42_v12   ;;  %v428_v35 = vld [vmem:[%s827_s5 + $0x30] sm:$0xff]  ;;  %v429_v36 = vld [vmem:[%s827_s5 + $0x38] sm:$0xff]  ;;  %v228_v37 = vld [vmem:[%s828_s3] sm:$0xff] }
   0xd   :  { %v230_v38 = vld [vmem:[%s828_s3 + $0x10] sm:$0xff]  ;;  %v229_v11 = vld [vmem:[%s828_s3 + $0x8] sm:$0xff]  ;;  %v231_v12 = vld [vmem:[%s828_s3 + $0x18] sm:$0xff] }
   0xe   :  { %560 = vmatmul.mubr.msk.f32.gmra.mrb[2].mxu0 %vm86_vm0, %v33_v13  ;;  %587 = vmatprep.mubr.msk.f32.mxu1 %vm284_vm2, %v230_v38  ;;  %v232_v13 = vld [vmem:[%s828_s3 + $0x20] sm:$0xff]  ;;  %v233_v14 = vld [vmem:[%s828_s3 + $0x28] sm:$0xff] }
   0xf   :  { %562 = vmatprep.mubr.msk.f32.mxu0 %vm86_vm0, %v34_v15  ;;  %83 = vperm.xlu1 %626, %v45_v18   ;;  %v234_v15 = vld [vmem:[%s828_s3 + $0x30] sm:$0xff] }
  0x10   :  { %78 = vperm.xlu0 %625, %v44_v16   ;;  %v235_v16 = vld [vmem:[%s828_s3 + $0x38] sm:$0xff] }
  0x12   :  { %563 = vmatmul.mubr.msk.f32.gmra.mrb[4].mxu0 %vm86_vm0, %v35_v17 }
  0x13   :  { %565 = vmatprep.mubr.msk.f32.mxu0 %vm86_vm0, %v36_v19  ;;  %251 = vperm.xlu1 %626, %v237_v22  }
  0x14   :  { %246 = vperm.xlu0 %625, %v236_v20  }
  0x16   :  { %566 = vmatmul.mubr.msk.f32.gmra.mrb[6].mxu0 %vm86_vm0, %v37_v21 }
  0x17   :  { %261 = vperm.xlu1 %626, %v239_v24   ;;  %584 = vmatprep.mubr.msk.f32.mxu0 %vm284_vm2, %v228_v37 }
  0x18   :  { %256 = vperm.xlu0 %625, %v238_v23  }
  0x1b   :  { %437 = vperm.xlu1 %626, %v423_v26  }
  0x1c   :  { %432 = vperm.xlu0 %625, %v422_v25  }
  0x1f   :  { %442 = vperm.xlu1 %626, %v424_v28  }
  0x20   :  { %266 = vperm.xlu0 %625, %v240_v27  }
  0x23   :  { %447 = vperm.xlu1 %626, %v425_v30  }
  0x24   :  { %271 = vperm.xlu0 %625, %v241_v29  }
  0x27   :  { %452 = vperm.xlu1 %626, %v426_v32  }
  0x28   :  { %276 = vperm.xlu0 %625, %v242_v31  }
  0x2b   :  { %457 = vperm.xlu1 %626, %v427_v34  }
  0x2c   :  { %281 = vperm.xlu0 %625, %v243_v33  }
  0x2f   :  { %467 = vperm.xlu1 %626, %v429_v36  }
  0x30   :  { %462 = vperm.xlu0 %625, %v428_v35  }
  0x82   :  { %v59_v40 = vpop.permute.xlu1 %58 }
  0x83   :  { %v49_v39 = vpop.permute.xlu0 %48 }
  0x86   :  { %v64_v42 = vpop.permute.xlu1 %63 }
  0x87   :  { %v54_v41 = vpop.permute.xlu0 %53 }
  0x8a   :  { %v74_v52 = vpop.permute.xlu1 %73 }
  0x8b   :  { %v69_v55 = vpop.permute.xlu0 %68 }
  0x8e   :  { %v84_v0 = vpop.permute.xlu1 %83 }
  0x8f   :  { %v79_v3 = vpop.permute.xlu0 %78 }
  0x92   :  { %v252_v18 = vpop.permute.xlu1 %251 }
  0x93   :  { %v247_v17 = vpop.permute.xlu0 %246 }
  0x96   :  { %v262_v20 = vpop.permute.xlu1 %261 }
  0x97   :  { %v257_v19 = vpop.permute.xlu0 %256 }
  0x9a   :  { %v438_v22 = vpop.permute.xlu1 %437 }
  0x9b   :  { %v433_v21 = vpop.permute.xlu0 %432 }
  0x9e   :  { %v443_v24 = vpop.permute.xlu1 %442 }
  0x9f   :  { %v267_v23 = vpop.permute.xlu0 %266 }
  0xa2   :  { %v448_v26 = vpop.permute.xlu1 %447 }
  0xa3   :  { %v272_v25 = vpop.permute.xlu0 %271 }
  0xa7   :  { %v277_v35 = vpop.permute.xlu0 %276 }
  0xdd   :  { %v558_v43 = vpop.f32.mrb[0].mxu0 }
  0xde   :  { %v187_v44 = vadd.f32 %v558_v43, %v54_v41  ;;  %v181_v45 = vpop.f32.mrb[1].mxu0 }
  0xdf   :  { %v182_v46 = vadd.f32 %v181_v45, %v49_v39 }
  0xe0   :  { %v221_v47 = vmax.f32 %v187_v44, 0.0 }
  0xe1   :  { %v220_v48 = vmax.f32 %v182_v46, 0.0  ;;  %v561_v49 = vpop.f32.mrb[2].mxu0 }
  0xe2   :  { %v197_v50 = vadd.f32 %v561_v49, %v64_v42  ;;  %v191_v51 = vpop.f32.mrb[3].mxu0 }
  0xe3   :  { %v600_v53 = vpack.c.bf16 %v221_v47, %v220_v48  ;;  %v192_v54 = vadd.f32 %v191_v51, %v59_v40  ;;  %v453_v40 = vpop.permute.xlu1 %452  ;;  %v282_v51 = vpop.permute.xlu0 %281 }
  0xe4   :  { %v223_v56 = vmax.f32 %v197_v50, 0.0 }
  0xe5   :  { %v222_v57 = vmax.f32 %v192_v54, 0.0  ;;  %v564_v58 = vpop.f32.mrb[4].mxu0  ;;  %601 = vmatprep.subr.bf16.mxu0 %v600_v53  ;;  %616 = vmatprep.subr.bf16.mxu1 %v600_v53 }
  0xe6   :  { %v207_v59 = vadd.f32 %v564_v58, %v74_v52  ;;  %v201_v60 = vpop.f32.mrb[5].mxu0  ;;  %603 = vmatpush3.bf16.msra.mxu0 %v600_v53  ;;  %620 = vmatpush3.bf16.msra.mxu1 %v600_v53 }
  0xe7   :  { %v604_v61 = vpack.c.bf16 %v223_v56, %v222_v57  ;;  %v202_v62 = vadd.f32 %v201_v60, %v69_v55  ;;  %v458_v58 = vpop.permute.xlu1 %457 }
  0xe8   :  { %v225_v63 = vmax.f32 %v207_v59, 0.0 }
  0xe9   :  { %v224_v1 = vmax.f32 %v202_v62, 0.0  ;;  %v567_v2 = vpop.f32.mrb[6].mxu0  ;;  %605 = vmatprep.subr.bf16.mxu0 %v604_v61  ;;  %617 = vmatprep.subr.bf16.mxu1 %v604_v61 }
  0xea   :  { %v217_v4 = vadd.f32 %v567_v2, %v84_v0  ;;  %v211_v5 = vpop.f32.mrb[7].mxu0  ;;  %607 = vmatpush3.bf16.msra.mxu0 %v604_v61  ;;  %621 = vmatpush3.bf16.msra.mxu1 %v604_v61 }
  0xeb   :  { %v608_v6 = vpack.c.bf16 %v225_v63, %v224_v1  ;;  %v212_v7 = vadd.f32 %v211_v5, %v79_v3  ;;  %v463_v1 = vpop.permute.xlu0 %462 }
  0xec   :  { %v227_v8 = vmax.f32 %v217_v4, 0.0  ;;  %v468_v4 = vpop.permute.xlu1 %467 }
  0xed   :  { %v226_v9 = vmax.f32 %v212_v7, 0.0  ;;  %609 = vmatprep.subr.bf16.mxu0 %v608_v6  ;;  %618 = vmatprep.subr.bf16.mxu1 %v608_v6 }
  0xee   :  { %611 = vmatpush3.bf16.msra.mxu0 %v608_v6  ;;  %622 = vmatpush3.bf16.msra.mxu1 %v608_v6 }
  0xef   :  { %v612_v10 = vpack.c.bf16 %v227_v8, %v226_v9 }
  0xf1   :  { %613 = vmatprep.subr.bf16.mxu0 %v612_v10  ;;  %619 = vmatprep.subr.bf16.mxu1 %v612_v10 }
  0xf2   :  { %615 = vmatpush3.bf16.msra.mxu0 %v612_v10  ;;  %623 = vmatpush3.bf16.msra.mxu1 %v612_v10 }
  0xf5   :  { %585 = vmatmul.mubr.msk.f32.vlgmr.msra.gmra.mrb[8].mxu0 %vm284_vm2, %v229_v11  ;;  %588 = vmatmul.mubr.msk.f32.vlgmr.msra.gmra.mrb[0].mxu1 %vm284_vm2, %v231_v12 }
  0xf6   :  { %590 = vmatprep.mubr.msk.f32.mxu1 %vm284_vm2, %v232_v13  ;;  %v492_v13 = vstv %s829_s6 }
  0xf9   :  { %591 = vmatmul.mubr.msk.f32.gmra.mrb[2].mxu1 %vm284_vm2, %v233_v14 }
  0xfa   :  { %593 = vmatprep.mubr.msk.f32.mxu1 %vm284_vm2, %v234_v15 }
  0xfd   :  { %594 = vmatmul.mubr.msk.f32.gmra.mrb[4].mxu1 %vm284_vm2, %v235_v16 }
 0x1c8   :  { %v586_v27 = vpop.f32.mrb[8].mxu0  ;;  %v589_v28 = vpop.f32.mrb[0].mxu1 }
 0x1c9   :  { %v381_v29 = vadd.f32 %v586_v27, %v252_v18  ;;  %v391_v30 = vadd.f32 %v589_v28, %v262_v20  ;;  %v375_v31 = vpop.f32.mrb[9].mxu0  ;;  %v385_v32 = vpop.f32.mrb[1].mxu1 }
 0x1ca   :  { %v376_v33 = vadd.f32 %v375_v31, %v247_v17  ;;  %v386_v34 = vadd.f32 %v385_v32, %v257_v19 }
 0x1cb   :  { %v415_v36 = vmax.f32 %v381_v29, 0.0  ;;  %v417_v42 = vmax.f32 %v391_v30, 0.0 }
 0x1cc   :  { %v414_v37 = vmax.f32 %v376_v33, 0.0  ;;  %v416_v38 = vmax.f32 %v386_v34, 0.0  ;;  %v592_v39 = vpop.f32.mrb[2].mxu1 }
 0x1cd   :  { %v471_v41 = vmul.f32 %v438_v22, %v415_v36  ;;  %v395_v43 = vpop.f32.mrb[3].mxu1  ;;  %v401_v45 = vadd.f32 %v592_v39, %v272_v25  ;;  %v473_v52 = vmul.f32 %v448_v26, %v417_v42 }
 0x1ce   :  { %v470_v44 = vmul.f32 %v433_v21, %v414_v37  ;;  %v396_v46 = vadd.f32 %v395_v43, %v267_v23  ;;  %v472_v48 = vmul.f32 %v443_v24, %v416_v38 }
 0x1cf   :  { %v419_v55 = vmax.f32 %v401_v45, 0.0 }
 0x1d0   :  { %v478_v47 = vadd.f32 %v471_v41, %v470_v44  ;;  %v418_v49 = vmax.f32 %v396_v46, 0.0  ;;  %v595_v50 = vpop.f32.mrb[4].mxu1 }
 0x1d1   :  { %v405_v53 = vpop.f32.mrb[5].mxu1  ;;  %v411_v56 = vadd.f32 %v595_v50, %v282_v51  ;;  %v475_v62 = vmul.f32 %v458_v58, %v419_v55 }
 0x1d2   :  { %v479_v54 = vadd.f32 %v478_v47, %v472_v48  ;;  %v406_v57 = vadd.f32 %v405_v53, %v277_v35  ;;  %v474_v59 = vmul.f32 %v453_v40, %v418_v49 }
 0x1d3   :  { %v421_v0 = vmax.f32 %v411_v56, 0.0 }
 0x1d4   :  { %v480_v60 = vadd.f32 %v479_v54, %v473_v52  ;;  %v420_v61 = vmax.f32 %v406_v57, 0.0 }
 0x1d5   :  { %v477_v5 = vmul.f32 %v468_v4, %v421_v0 }
 0x1d6   :  { %v481_v63 = vadd.f32 %v480_v60, %v474_v59  ;;  %v476_v2 = vmul.f32 %v463_v1, %v420_v61 }
 0x1d8   :  { %v482_v3 = vadd.f32 %v481_v63, %v475_v62 }
 0x1da   :  { %v483_v6 = vadd.f32 %v482_v3, %v476_v2 }
 0x1dc   :  { %v484_v7 = vadd.f32 %v483_v6, %v477_v5 }
 0x1de   :  { %v485_v8 = vrot.slane %v484_v7, 4 }
 0x1e0   :  { %v486_v9 = vadd.f32 %v485_v8, %v484_v7 }
 0x1e2   :  { %v487_v10 = vrot.slane %v486_v9, 2 }
 0x1e4   :  { %v488_v11 = vadd.f32 %v487_v10, %v486_v9 }
 0x1e6   :  { %v489_v12 = vrot.slane %v488_v11, 1 }
 0x1e8   :  { %v490_v14 = vadd.f32 %v489_v12, %v488_v11 }
 0x1ea   :  { %v493_v15 = vadd.f32 %v492_v13, %v490_v14 }
 0x1ec   :  { %v522_v16 = vmul.f32 -1.442695, %v493_v15 }
 0x1ee   :  { %627 = vpow2.f32 %v522_v16 }
 0x1f8   :  { %v628_v17 = vpop.eup %627 }
 0x1f9   :  { %v497_v18 = vadd.f32 1.0, %v628_v17 }
 0x1fb   :  { %629 = vrcp.f32 %v497_v18 }
 0x205   :  { %v630_v19 = vpop.eup %629 }
 0x206   :  { %500 = vst [vmem:[%s830_s7] sm:$0x1] %v630_v19 }

</bundles_post_ra>
